<compile_context>
chip_gen: v6e
topology: v6e:2x2x1
jax: 0.10.0
libtpu: 0.0.40
codegen_flags: <defaults>
</compile_context>

<pallas_src>
import jax
import jax.numpy as jnp
import numpy as np
from jax import lax
from jax.experimental import pallas as pl
from jax.experimental.pallas import tpu as pltpu

# Filter definition (matches Downsample.__init__): outer([1,2,1],[1,2,1]) / sum.
# Only the pure-JAX reference uses this; the kernel bakes the separable taps + 1/16 in.
_FILT_1D = np.array([1.0, 2.0, 1.0], dtype=np.float32)
_FILT_2D = _FILT_1D[:, None] * _FILT_1D[None, :]
_FILT_2D = _FILT_2D / _FILT_2D.sum()  # (3, 3)


def _blur_pool_kernel(x00_ref, x10_ref, x01_ref, x11_ref, o_ref):
    """Separable depthwise 3x3 stride-2 blur on TB folded (n, c) planes.

    Phase arrays of the reflect-padded plane xpad (all blocks have TB leading planes):
      x00_ref : (TB, Ho+1, Wo+1)   x00[i, j] = xpad[2i,   2j  ]
      x10_ref : (TB, Ho,   Wo+1)   x10[i, j] = xpad[2i+1, 2j  ]
      x01_ref : (TB, Ho+1, Wo  )   x01[i, j] = xpad[2i,   2j+1]
      x11_ref : (TB, Ho,   Wo  )   x11[i, j] = xpad[2i+1, 2j+1]
      o_ref   : (TB, Ho,   Wo)
    """
    _, Ho, Wo = o_ref.shape
    # Row pass ([1,2,1] over padded rows 2i, 2i+1, 2i+2), in the input dtype.
    c0 = x00_ref[:, :Ho, :] + 2 * x10_ref[...] + x00_ref[:, 1:, :]   # even cols, (TB, Ho, Wo+1)
    c1 = x01_ref[:, :Ho, :] + 2 * x11_ref[...] + x01_ref[:, 1:, :]   # odd  cols, (TB, Ho, Wo)
    # Column pass + 1/16 scale in f32 (exact for f32 inputs, benign rounding for bf16).
    c0 = c0.astype(jnp.float32)
    acc = (c0[:, :, :Wo] + 2.0 * c1.astype(jnp.float32) + c0[:, :, 1:]) * (1.0 / 16.0)
    o_ref[...] = acc.astype(o_ref.dtype)


def _choose_block_batch(B, Ho, Wo, itemsize, budget_bytes=8 << 20):
    """Pick TB (planes per grid step) so double-buffered blocks + temporaries fit ~budget."""
    in_out_elems = ((Ho + 1) * (Wo + 1) + Ho * (Wo + 1) + (Ho + 1) * Wo + 2 * Ho * Wo)
    per_b = 2 * in_out_elems * itemsize + 3 * Ho * (Wo + 1) * 4  # 2x pipeline bufs + f32 temps
    tb = max(1, budget_bytes // per_b)
    if B >= 2:
        tb = min(tb, B // 2)          # >= 2 grid steps so both v7x TensorCores get work
    tb = max(1, min(tb, B))
    while B % tb:                     # largest divisor of B <= tb (no ragged tail block)
        tb -= 1
    return int(tb), int(per_b)


@jax.jit
def anti_alias_downsample(x_nchw):
    """AntiAliasDownsampleLayer(channels=C, filt_size=3, stride=2) forward. NCHW in / NCHW out."""
    N, C, H, W = x_nchw.shape
    assert H >= 2 and W >= 2, "reflect pad of 1 requires spatial dims >= 2"
    Ho, Wo = (H - 1) // 2 + 1, (W - 1) // 2 + 1

    B = N * C
    x = x_nchw.reshape(B, H, W)                              # free: depthwise => fold (N, C)
    xpad = jnp.pad(x, ((0, 0), (1, 1), (1, 1)), mode="reflect")
    # Stride-2 phase split (only wrapper-side data movement; pad + slices fuse under jit).
    x00 = xpad[:, 0:2 * Ho + 1:2, 0:2 * Wo + 1:2]            # (B, Ho+1, Wo+1)
    x10 = xpad[:, 1:2 * Ho:2,     0:2 * Wo + 1:2]            # (B, Ho,   Wo+1)
    x01 = xpad[:, 0:2 * Ho + 1:2, 1:2 * Wo:2]                # (B, Ho+1, Wo)
    x11 = xpad[:, 1:2 * Ho:2,     1:2 * Wo:2]                # (B, Ho,   Wo)

    itemsize = jnp.dtype(x_nchw.dtype).itemsize
    TB, per_b = _choose_block_batch(B, Ho, Wo, itemsize)
    vmem_limit = int(min(max(TB * per_b + (8 << 20), 16 << 20), 56 << 20))

    in_specs = [
        pl.BlockSpec((TB, Ho + 1, Wo + 1), lambda b: (b, 0, 0)),
        pl.BlockSpec((TB, Ho,     Wo + 1), lambda b: (b, 0, 0)),
        pl.BlockSpec((TB, Ho + 1, Wo),     lambda b: (b, 0, 0)),
        pl.BlockSpec((TB, Ho,     Wo),     lambda b: (b, 0, 0)),
    ]
    out_spec = pl.BlockSpec((TB, Ho, Wo), lambda b: (b, 0, 0))

    in_bytes = (x00.size + x10.size + x01.size + x11.size) * itemsize
    out_bytes = B * Ho * Wo * itemsize
    cost = pl.CostEstimate(flops=2 * 9 * B * Ho * Wo, transcendentals=0,
                           bytes_accessed=in_bytes + out_bytes)

    out = pl.pallas_call(
        _blur_pool_kernel,
        out_shape=jax.ShapeDtypeStruct((B, Ho, Wo), x_nchw.dtype),
        grid_spec=pltpu.PrefetchScalarGridSpec(
            num_scalar_prefetch=0,
            grid=(B // TB,),
            in_specs=in_specs,
            out_specs=out_spec,
        ),
        compiler_params=pltpu.CompilerParams(
            dimension_semantics=("parallel",),
            vmem_limit_bytes=vmem_limit,
        ),
        cost_estimate=cost,
    )(x00, x10, x01, x11)

    return out.reshape(N, C, Ho, Wo)


def _reference(x_nchw):
    """Pure-JAX reference: reflect pad + grouped (depthwise) conv, stride 2."""
    N, C, H, W = x_nchw.shape
    filt = jnp.broadcast_to(jnp.asarray(_FILT_2D)[None, None], (C, 1, 3, 3)).astype(x_nchw.dtype)
    xpad = jnp.pad(x_nchw, ((0, 0), (0, 0), (1, 1), (1, 1)), mode="reflect")
    return lax.conv_general_dilated(
        xpad, filt, window_strides=(2, 2), padding="VALID",
        feature_group_count=C, dimension_numbers=("NCHW", "OIHW", "NCHW"))


if __name__ == "__main__":
    key = jax.random.PRNGKey(0)
    x = jax.random.normal(key, (2, 4, 16, 16), dtype=jnp.float32)  # NCHW, like the PyTorch module

    out = jax.block_until_ready(anti_alias_downsample(x))
    assert out.shape == (2, 4, 8, 8), out.shape
    np.testing.assert_allclose(np.asarray(out), np.asarray(_reference(x)), rtol=1e-5, atol=1e-5)

    # Odd spatial dims (supported by the PyTorch module; previous version asserted them away).
    x2 = jax.random.normal(jax.random.PRNGKey(1), (1, 3, 9, 11), dtype=jnp.float32)
    out2 = jax.block_until_ready(anti_alias_downsample(x2))
    np.testing.assert_allclose(np.asarray(out2), np.asarray(_reference(x2)), rtol=1e-5, atol=1e-5)

    print("KERNEL_OK")
</pallas_src>

<mosaic_0001>
module attributes {stable_mosaic.version = 11 : i64} {
  func.func @_blur_pool_kernel(%arg0: i32, %arg1: memref<4x9x9xf32, #tpu.memory_space<vmem>>, %arg2: memref<4x8x9xf32, #tpu.memory_space<vmem>>, %arg3: memref<4x9x8xf32, #tpu.memory_space<vmem>>, %arg4: memref<4x8x8xf32, #tpu.memory_space<vmem>>, %arg5: memref<4x8x8xf32, #tpu.memory_space<vmem>>) attributes {dimension_semantics = [#tpu.dimension_semantics<parallel>], iteration_bounds = array<i64: 2>, scalar_prefetch = 0 : i64, scratch_operands = 0 : i64, tpu.core_type = #tpu.core_type<tc>, window_params = [{transform_indices = @transform_0, window_bounds = array<i64: 4, 9, 9>}, {transform_indices = @transform_1, window_bounds = array<i64: 4, 8, 9>}, {transform_indices = @transform_2, window_bounds = array<i64: 4, 9, 8>}, {transform_indices = @transform_3, window_bounds = array<i64: 4, 8, 8>}, {transform_indices = @transform_4, window_bounds = array<i64: 4, 8, 8>}]} {
    %c0 = arith.constant 0 : index
    %c0_0 = arith.constant 0 : index
    %c0_1 = arith.constant 0 : index
    %0 = vector.load %arg1[%c0, %c0_0, %c0_1] : memref<4x9x9xf32, #tpu.memory_space<vmem>>, vector<4x8x9xf32>
    %c0_2 = arith.constant 0 : index
    %c0_3 = arith.constant 0 : index
    %c0_4 = arith.constant 0 : index
    %1 = vector.load %arg2[%c0_2, %c0_3, %c0_4] : memref<4x8x9xf32, #tpu.memory_space<vmem>>, vector<4x8x9xf32>
    %cst = arith.constant 2.000000e+00 : f32
    %2 = vector.broadcast %cst : f32 to vector<4x8x9xf32>
    %3 = arith.mulf %2, %1 : vector<4x8x9xf32>
    %4 = arith.addf %0, %3 : vector<4x8x9xf32>
    %c0_5 = arith.constant 0 : index
    %c1 = arith.constant 1 : index
    %c0_6 = arith.constant 0 : index
    %5 = vector.load %arg1[%c0_5, %c1, %c0_6] : memref<4x9x9xf32, #tpu.memory_space<vmem>>, vector<4x8x9xf32>
    %6 = arith.addf %4, %5 : vector<4x8x9xf32>
    %c0_7 = arith.constant 0 : index
    %c0_8 = arith.constant 0 : index
    %c0_9 = arith.constant 0 : index
    %7 = vector.load %arg3[%c0_7, %c0_8, %c0_9] : memref<4x9x8xf32, #tpu.memory_space<vmem>>, vector<4x8x8xf32>
    %c0_10 = arith.constant 0 : index
    %c0_11 = arith.constant 0 : index
    %c0_12 = arith.constant 0 : index
    %8 = vector.load %arg4[%c0_10, %c0_11, %c0_12] : memref<4x8x8xf32, #tpu.memory_space<vmem>>, vector<4x8x8xf32>
    %cst_13 = arith.constant 2.000000e+00 : f32
    %9 = vector.broadcast %cst_13 : f32 to vector<4x8x8xf32>
    %10 = arith.mulf %9, %8 : vector<4x8x8xf32>
    %11 = arith.addf %7, %10 : vector<4x8x8xf32>
    %c0_14 = arith.constant 0 : index
    %c1_15 = arith.constant 1 : index
    %c0_16 = arith.constant 0 : index
    %12 = vector.load %arg3[%c0_14, %c1_15, %c0_16] : memref<4x9x8xf32, #tpu.memory_space<vmem>>, vector<4x8x8xf32>
    %13 = arith.addf %11, %12 : vector<4x8x8xf32>
    %14 = vector.extract_strided_slice %6 {offsets = [0, 0, 0], sizes = [4, 8, 8], strides = [1, 1, 1]} : vector<4x8x9xf32> to vector<4x8x8xf32>
    %cst_17 = arith.constant 2.000000e+00 : f32
    %15 = vector.broadcast %cst_17 : f32 to vector<4x8x8xf32>
    %16 = arith.mulf %15, %13 : vector<4x8x8xf32>
    %17 = arith.addf %14, %16 : vector<4x8x8xf32>
    %18 = vector.extract_strided_slice %6 {offsets = [0, 0, 1], sizes = [4, 8, 8], strides = [1, 1, 1]} : vector<4x8x9xf32> to vector<4x8x8xf32>
    %19 = arith.addf %17, %18 : vector<4x8x8xf32>
    %cst_18 = arith.constant 6.250000e-02 : f32
    %20 = vector.broadcast %cst_18 : f32 to vector<4x8x8xf32>
    %21 = arith.mulf %19, %20 : vector<4x8x8xf32>
    %c0_19 = arith.constant 0 : index
    %c0_20 = arith.constant 0 : index
    %c0_21 = arith.constant 0 : index
    %22 = vector.load %arg5[%c0_19, %c0_20, %c0_21] : memref<4x8x8xf32, #tpu.memory_space<vmem>>, vector<4x8x8xf32>
    tpu.vector_store %arg5[%c0_19, %c0_20, %c0_21], %21 {strides = array<i32>} : memref<4x8x8xf32, #tpu.memory_space<vmem>>, vector<4x8x8xf32>,
    return
  }
  func.func @transform_0(%arg0: i32) -> (i32, i32, i32) {
    %c0_i32 = arith.constant 0 : i32
    %c0_i32_0 = arith.constant 0 : i32
    %c0_i32_1 = arith.constant 0 : i32
    return %arg0, %c0_i32, %c0_i32_0 : i32, i32, i32
  }
  func.func @transform_1(%arg0: i32) -> (i32, i32, i32) {
    %c0_i32 = arith.constant 0 : i32
    %c0_i32_0 = arith.constant 0 : i32
    %c0_i32_1 = arith.constant 0 : i32
    return %arg0, %c0_i32, %c0_i32_0 : i32, i32, i32
  }
  func.func @transform_2(%arg0: i32) -> (i32, i32, i32) {
    %c0_i32 = arith.constant 0 : i32
    %c0_i32_0 = arith.constant 0 : i32
    %c0_i32_1 = arith.constant 0 : i32
    return %arg0, %c0_i32, %c0_i32_0 : i32, i32, i32
  }
  func.func @transform_3(%arg0: i32) -> (i32, i32, i32) {
    %c0_i32 = arith.constant 0 : i32
    %c0_i32_0 = arith.constant 0 : i32
    %c0_i32_1 = arith.constant 0 : i32
    return %arg0, %c0_i32, %c0_i32_0 : i32, i32, i32
  }
  func.func @transform_4(%arg0: i32) -> (i32, i32, i32) {
    %c0_i32 = arith.constant 0 : i32
    %c0_i32_0 = arith.constant 0 : i32
    %c0_i32_1 = arith.constant 0 : i32
    return %arg0, %c0_i32, %c0_i32_0 : i32, i32, i32
  }
}

</mosaic_0001>

<bundles_post_ra>
// kernel: anti_alias_downsample.1
= control target key start
LH: loop header
LB: loop body
LE: loop exit
PB: predicated region body
PF: predicated region fallthrough
CT: control target
= control target key end

     0   :  { %9 = vsyncpa [#allocation3], 0  ;;  %s754_s0 = inlined_call_operand.vmem [shape: f32[8,9,9], index: 0, kind: input, shape index: {}]   ;;  %s755_s1 = inlined_call_operand.vmem [shape: f32[8,8,9], index: 1, kind: input, shape index: {}]   ;;  %s756_s2 = inlined_call_operand.vmem [shape: f32[8,9,8], index: 2, kind: input, shape index: {}]   ;;  %s757_s3 = inlined_call_operand.vmem [shape: f32[8,8,8], index: 3, kind: input, shape index: {}]   ;;  %s758_s4 = inlined_call_operand.hbm [shape: f32[8,8,8], index: 4, kind: output, shape index: {}]  }
   0x1   :  { %11 = vsyncpa [#allocation3 + $0x1], 0  ;;  %s624_s15 = smov 0   ;;  %s626_s16 = smov 0  }
   0x2   :  { %s628_s17 = smov 0   ;;  %s630_s18 = smov 0  }
   0x3 LB: > { %s645_s19 = sadd.s32 4294967295, %s593_s18   ;;  %s468_s20 = sadd.s32 4294967294, %s593_s18   ;;  %s593_s18 = sphi %s630_s18, %s764_s18   ;;  %s589_s17 = sphi %s628_s17, %s763_s17   ;;  %s585_s16 = sphi %s626_s16, %s762_s16   ;;  %s581_s15 = sphi %s624_s15, %s761_s15  }
   0x4   : > { %s649_s21 = sadd.s32 1, %s593_s18   ;;  %s128_s22 = sadd.s32 1, %s589_s17 }
   0x5   : > { %s125_s23 = ssub.s32 %s593_s18, %s649_s21  ;;  %p138_p0 = scmp.ne.s32.totalorder %s589_s17, %s585_s16 }
   0x6   : > { %p126_p1 = scmp.eq.s32.totalorder %s125_s23, 0  ;;  %p139_p2 = scmp.eq.s32.totalorder %s645_s19, 1 }
   0x7   : > { %p144_p3 = scmp.ne.s32.totalorder %s585_s16, %s581_s15  ;;  %p145_p4 = scmp.eq.s32.totalorder %s468_s20, 1 }
   0x8   : > { %s660_s24 = scalar_select %p126_p1, %s589_s17, %s128_s22  }
   0x9   : > { %p662_p5 = por %p139_p2, %p138_p0  ;;  %p666_p6 = por %p145_p4, %p144_p3 }
   0xa   : > { %p471_p7 = scmp.ge.s32.totalorder %s593_s18, 1  ;;  %p201_p8 = scmp.lt.s32.totalorder %s593_s18, 3 }
   0xc   : > { %p202_p9 = pnand %p471_p7, %p201_p8 }
   0xd   : > { %s473_s27 = sshll.u32 (!%p202_p9), %s645_s19, 2  ;;  %s595_s22 = smov (!%p202_p9), 127  }
   0xe   : > { %205 = sbr.rel (%p202_p9) target bundleno = 168 (0xa8), region = 36  ;;  %p245_p10 = scmp.lt.s32.totalorder (!%p202_p9), %s473_s27, 7 }
   0xf   : > { %s241_s23 = sand.u32 (!%p202_p9), 1, %s585_s16   ;;  %s490_s30 = sshll.u32 (!%p202_p9), %s645_s19, 9 }
  0x10   : > { %s710_s7 = scalar_lea.hbm (!%p202_p9), %s758_s4, %s490_s30  ;;  %s714_s19 = scalar_lea.sflag (!%p202_p9), [#allocation3], %s241_s23 }
  0x13   : > { %s766_s27 = smov (!%p245_p10, %s473_s27), 7  ;;  %vm351_vm0 = vcmask 64512  }
  0x14   : > { %s488_s28 = sshll.u32 %s766_s27, 4  ;;  %s477_s29 = sshll.u32 %s766_s27, 3 }
  0x15   : > { %s249_s6 = scalar_lea.vmem %s754_s0, %s488_s28  ;;  %s255_s9 = scalar_lea.vmem %s755_s1, %s477_s29 }
  0x16   : > { %v273_v0 = vld [vmem:[%s249_s6 + $0x20] sm:$0xff]  ;;  %v277_v1 = vld [vmem:[%s255_s9 + $0x10] sm:$0xff]  ;;  %s682_s12 = scalar_lea.vmem %s756_s2, %s488_s28  ;;  %s687_s20 = scalar_lea.vmem %s757_s3, %s477_s29  ;;  %v278_v8 = vld [vmem:[%s255_s9 + $0x18] sm:$0xff] }
  0x17   : > { %v281_v2 = vmul.f32 2.0, %v277_v1  ;;  %v271_v3 = vld [vmem:[%s249_s6] sm:$0xff]  ;;  %v274_v7 = vld [vmem:[%s249_s6 + $0x30] sm:$0xff]  ;;  %v282_v11 = vmul.f32 2.0, %v278_v8  ;;  %v276_v13 = vld [vmem:[%s255_s9 + $0x8] sm:$0xff]  ;;  %s472_s27 = sshll.u32 %s241_s23, 5 }
  0x18   : > { %v275_v4 = vld [vmem:[%s255_s9] sm:$0xff]  ;;  %v272_v12 = vld [vmem:[%s249_s6 + $0x10] sm:$0xff]  ;;  %v280_v16 = vmul.f32 2.0, %v276_v13  ;;  %v302_v30 = vld [vmem:[%s687_s20 + $0x18] sm:$0xff]  ;;  %s243_s28 = scalar_lea.vmem [#allocation2], %s472_s27  ;;  %s596_s9 = smov [#allocation2]  }
  0x19   : > { %v289_v5 = vld [vmem:[%s249_s6 + $0x21] sm:$0xff]  ;;  %v279_v6 = vmul.f32 2.0, %v275_v4  ;;  %v285_v9 = vadd.f32 %v281_v2, %v273_v0  ;;  %v290_v15 = vld [vmem:[%s249_s6 + $0x31] sm:$0xff]  ;;  %v286_v20 = vadd.f32 %v282_v11, %v274_v7  ;;  %v306_v34 = vmul.f32 2.0, %v302_v30  ;;  %s370_s29 = sshll.u32 %s243_s28, 4  ;;  %s537_s10 = sshll.u32 %s596_s9, 4  ;;  %s705_s29 = int_to_ptr.vmem [resolvable:$true] %s370_s29  ;;  %s538_s10 = int_to_ptr.vmem [resolvable:$false] %s537_s10 }
  0x1a   : > { %v287_v10 = vld [vmem:[%s249_s6 + $0x1] sm:$0xff]  ;;  %v301_v18 = vld [vmem:[%s687_s20 + $0x10] sm:$0xff]  ;;  %v284_v26 = vadd.f32 %v280_v16, %v272_v12  ;;  %s533_s8 = scalar_lea.vmem %s705_s29, 512  ;;  %s539_s11 = scalar_lea.vmem %s538_s10, 1024 }
  0x1b   : > { %v283_v14 = vadd.f32 %v279_v6, %v271_v3  ;;  %v297_v17 = vld [vmem:[%s682_s12 + $0x20] sm:$0xff]  ;;  %v293_v19 = vadd.f32 %v289_v5, %v285_v9  ;;  %v288_v21 = vld [vmem:[%s249_s6 + $0x11] sm:$0xff]  ;;  %v305_v22 = vmul.f32 2.0, %v301_v18  ;;  %v294_v31 = vadd.f32 %v290_v15, %v286_v20  ;;  %v300_v36 = vld [vmem:[%s687_s20 + $0x8] sm:$0xff]  ;;  %p534_p11 = scmp.ne.s32.totalorder %s705_s29, %s533_s8  ;;  %p540_p0 = scmp.lt.s32.totalorder %s705_s29, %s538_s10 }
  0x1c   : > { %v295_v23 = vld [vmem:[%s682_s12] sm:$0xff]  ;;  %v298_v29 = vld [vmem:[%s682_s12 + $0x30] sm:$0xff]  ;;  %v292_v37 = vadd.f32 %v288_v21, %v284_v26  ;;  %v304_v40 = vmul.f32 2.0, %v300_v36  ;;  %p541_p1 = scmp.lt.s32.totalorder %s539_s11, %s533_s8 }
  0x1d   : > { %v299_v24 = vld [vmem:[%s687_s20] sm:$0xff]  ;;  %v291_v25 = vadd.f32 %v287_v10, %v283_v14  ;;  %335 = vrot.lane.b32.xlu1 %v293_v19, %s595_s22  ;;  %v309_v32 = vadd.f32 %v305_v22, %v297_v17  ;;  %v296_v35 = vld [vmem:[%s682_s12 + $0x10] sm:$0xff]  ;;  %v310_v42 = vadd.f32 %v306_v34, %v298_v29  ;;  %p535_p12 = pnand %p534_p11, %p662_p5 }
  0x1e   : > { %v313_v27 = vld [vmem:[%s682_s12 + $0x21] sm:$0xff]  ;;  %v303_v28 = vmul.f32 2.0, %v299_v24  ;;  %v314_v39 = vld [vmem:[%s682_s12 + $0x31] sm:$0xff]  ;;  %v308_v45 = vadd.f32 %v304_v40, %v296_v35  ;;  %p542_p2 = por %p541_p1, %p540_p0 }
  0x1f   : > { %v311_v33 = vld [vmem:[%s682_s12 + $0x1] sm:$0xff]  ;;  %331 = vrot.lane.b32.xlu0 %v291_v25, %s595_s22  ;;  %v317_v41 = vadd.f32 %v313_v27, %v309_v32  ;;  %v312_v43 = vld [vmem:[%s682_s12 + $0x11] sm:$0xff]  ;;  %v318_v47 = vadd.f32 %v314_v39, %v310_v42  ;;  %p536_p13 = pneg %p535_p12 }
  0x20   : > { %v307_v38 = vadd.f32 %v303_v28, %v295_v23  ;;  %v316_v49 = vadd.f32 %v312_v43, %v308_v45 }
  0x21   : > { %337 = vrot.lane.b32.xlu1 %v294_v31, %s595_s22  ;;  %v321_v46 = vmul.f32 2.0, %v317_v41  ;;  %v322_v51 = vmul.f32 2.0, %v318_v47  ;;  %p543_p3 = pnand %p542_p2, %p536_p13 }
  0x22   : > { %v315_v44 = vadd.f32 %v311_v33, %v307_v38  ;;  %v320_v53 = vmul.f32 2.0, %v316_v49 }
  0x23   : > { %333 = vrot.lane.b32.xlu0 %v292_v37, %s595_s22  ;;  %v325_v50 = vadd.f32 %v321_v46, %v293_v19  ;;  %v326_v54 = vadd.f32 %v322_v51, %v294_v31 }
  0x24   : > { %v319_v48 = vmul.f32 2.0, %v315_v44  ;;  %v324_v55 = vadd.f32 %v320_v53, %v292_v37 }
  0x26   : > { %v323_v52 = vadd.f32 %v319_v48, %v291_v25 }
  0x8f   : > { %v336_v56 = vpop.permute.xlu1 %335 }
  0x90   : > { %v345_v57 = vadd.f32 %v336_v56, %v325_v50 }
  0x91   : > { %v332_v58 = vpop.permute.xlu0 %331 }
  0x92   : > { %v343_v59 = vadd.f32 %v332_v58, %v323_v52  ;;  %v349_v60 = vmul.f32 0.0625, %v345_v57 }
  0x93   : > { %v338_v62 = vpop.permute.xlu1 %337 }
  0x94   : > { %v347_v61 = vmul.f32 0.0625, %v343_v59  ;;  %354 = vst.msk [vmem:[%s243_s28 + $0x10] sm:$0xff] %vm351_vm0, %v349_v60  ;;  %v346_v63 = vadd.f32 %v338_v62, %v326_v54 }
  0x95   : > { %v334_v0 = vpop.permute.xlu0 %333 }
  0x96   : > { %352 = vst.msk [vmem:[%s243_s28] sm:$0xff] %vm351_vm0, %v347_v61  ;;  %v344_v1 = vadd.f32 %v334_v0, %v324_v55  ;;  %v350_v2 = vmul.f32 0.0625, %v346_v63 }
  0x98   : > { %v348_v3 = vmul.f32 0.0625, %v344_v1  ;;  %355 = vst.msk [vmem:[%s243_s28 + $0x18] sm:$0xff] %vm351_vm0, %v350_v2 }
  0x9a   : > { %353 = vst.msk [vmem:[%s243_s28 + $0x8] sm:$0xff] %vm351_vm0, %v348_v3 }
  0x9b   : > { %546 = shalt.err (!%p543_p3)
}
  0x9c   : > { %s547_s12 = scalar_lea.hbm %s710_s7, 512  ;;  %s551_s20 = scalar_lea.hbm %s758_s4, 1024 }
  0x9d   : > { %p548_p4 = scmp.ne.s32.totalorder %s710_s7, %s547_s12  ;;  %p552_p9 = scmp.lt.s32.totalorder %s710_s7, %s758_s4 }
  0x9e   : > { %p553_p10 = scmp.lt.s32.totalorder %s551_s20, %s547_s12 }
  0x9f   : > { %p549_p7 = pnand %p548_p4, %p662_p5 }
  0xa0   : > { %p554_p11 = por %p553_p10, %p552_p9 }
  0xa1   : > { %p550_p8 = pneg %p549_p7 }
  0xa3   : > { %p555_p12 = pnand %p554_p11, %p550_p8 }
  0xa5   : > { %558 = shalt.err (!%p555_p12)
}
  0xa6   : > { %s597_s27 = smov 128   ;;  %s598_s28 = smov 8  }
  0xa7   : > { %491 = dma.vmem_to_hbm [thread:$0]  (%p662_p5), %s705_s29, 512, %s710_s7, %s714_s19, %s597_s27, %s597_s27, %s598_s28  }
  0xa8 PF: > { %p497_p13 = scmp.ge.s32.totalorder %s593_s18, 2  ;;  %s385_s30 = sand.u32 1, %s581_s15  }
  0xa9   : > { %s386_s5 = scalar_lea.sflag [#allocation3], %s385_s30 }
  0xaa   : > { %p494_p0 = pnand %p497_p13, %p666_p6 }
  0xac   : > { %p495_p1 = pneg %p494_p0 }
  0xae   : > { %576 = dma.done.wait (%p495_p1), %s386_s5, 512  }
  0xaf   : > { %578 = vsyncadd (%p495_p1), %s386_s5, 4294966784  ;;  %p14_p2 = scmp.ge.s32.totalorder %s649_s21, 4   ;;  %s761_s15 = smov %s585_s16 }
  0xb0   : > { %s762_s16 = smov %s589_s17  ;;  %s763_s17 = smov %s660_s24 }
  0xb1   : > { %s764_s18 = smov %s649_s21  ;;  %16 = sbr.rel (!%p14_p2) target bundleno = 3 (0x3), region = 80 }
  0xb6   :  { %391 = vsyncpa [#allocation3], 1 }
  0xb7   :  { %393 = vsyncpa [#allocation3 + $0x1], 1 }

</bundles_post_ra>
